<compile_context>
chip_gen: v6e
topology: v6e:2x2x1
jax: 0.10.0
libtpu: 0.0.40
codegen_flags: <defaults>
</compile_context>

<pallas_src>
import jax
import jax.numpy as jnp
from jax import lax
from jax.experimental import pallas as pl
from jax.experimental.pallas import tpu as pltpu

LN_EPS = 1e-5  # nn.LayerNorm default


def _patch_merging_kernel(x_ref, we_ref, wo_ref, b_ref, o_ref):
    # x_ref : (bt, 2, Wh, 2C)  fused block; axis 1 = original-row parity, the
    #                          last axis already holds the two horizontally
    #                          adjacent pixels concatenated.
    # we_ref / wo_ref : (2C, 2C)  re-stacked reduction weights (gamma folded in)
    # b_ref           : (1, 2C)   beta @ W^T, float32
    # o_ref           : (bt*Wh, 2C)
    bt, _, wh, two_c = x_ref.shape
    rows = bt * wh
    inv_k = 1.0 / (2 * two_c)          # 1 / (4*C)

    # Static parity slices (leading-dim only, no (8,128)-tile crossing), then a
    # leading-dim-merge reshape -> cheap relayout.
    xe = x_ref[:, 0, :, :].reshape(rows, two_c).astype(jnp.float32)
    xo = x_ref[:, 1, :, :].reshape(rows, two_c).astype(jnp.float32)

    # LayerNorm statistics over the full 4C features (split across xe | xo).
    mean = (jnp.sum(xe, axis=-1, keepdims=True)
            + jnp.sum(xo, axis=-1, keepdims=True)) * inv_k
    ce = xe - mean
    co = xo - mean
    var = (jnp.sum(ce * ce, axis=-1, keepdims=True)
           + jnp.sum(co * co, axis=-1, keepdims=True)) * inv_k
    inv_std = lax.rsqrt(var + LN_EPS)

    wdt = we_ref.dtype                  # bf16 weights -> bf16 MXU operands, f32 accumulation
    ye = (ce * inv_std).astype(wdt)
    yo = (co * inv_std).astype(wdt)

    acc = jnp.dot(ye, we_ref[...], preferred_element_type=jnp.float32)
    acc = acc + jnp.dot(yo, wo_ref[...], preferred_element_type=jnp.float32)
    acc = acc + b_ref[...]              # (1, 2C) broadcasts over rows
    o_ref[...] = acc.astype(o_ref.dtype)


def _tpu_vmem_capacity_bytes():
    """Physical VMEM per TensorCore; conservative 64 MiB fallback if unknown."""
    try:
        info = pltpu.get_tpu_info()
        return int(getattr(info, "vmem_capacity_bytes", 64 * 1024 * 1024))
    except Exception:
        return 64 * 1024 * 1024


def _pick_block_rows(num_rc, wh, two_c, n_out, x_bytes, w_bytes,
                     target_rows, vmem_budget, min_steps):
    """Pick bt = number of downsampled image rows processed per grid step.

    Constraints: bt divides num_rc = B*H/2; the output block (bt*wh, 2C) is
    sublane aligned (bt*wh % 8 == 0) unless it covers the whole output; the
    grid has at least `min_steps` steps when possible (>=2 on v7x so both
    TensorCores get work); and the working set (double-buffered pipeline
    blocks + in-kernel f32 temporaries) fits the VMEM budget.
    """
    # Grid-invariant weights/bias (still double-buffered by the pipeline).
    fixed = 2 * (two_c * n_out * w_bytes) * 2 + n_out * 4 * 2

    def per_step(bt):
        rows = bt * wh
        pipeline = (bt * 2 * wh * two_c * x_bytes      # fused input block
                    + rows * n_out * x_bytes) * 2      # output block; x2 = double-buffered
        # f32 intermediates live simultaneously around the matmul:
        # xe, xo, ce, co, ye, yo (~6x) plus the f32 accumulator.
        temps = 6 * rows * two_c * 4 + rows * n_out * 4
        return pipeline + temps

    cands = [bt for bt in range(1, num_rc + 1)
             if num_rc % bt == 0 and ((bt * wh) % 8 == 0 or bt == num_rc)]
    if min_steps > 1:
        constrained = [bt for bt in cands if num_rc // bt >= min_steps]
        if constrained:                  # never collapse the grid to (1,) on v7x
            cands = constrained

    good = [bt for bt in cands
            if bt * wh <= max(target_rows, wh)
            and fixed + per_step(bt) <= vmem_budget]
    if good:
        if min_steps > 1:
            even = [bt for bt in good if (num_rc // bt) % min_steps == 0]
            bt = max(even) if even else max(good)
        else:
            bt = max(good)
    else:
        bt = min(cands)
    return bt, fixed + per_step(bt)


def patch_merging_pallas(x, gamma, beta, w_red, input_resolution, *,
                         target_rows=None, mxu_dtype=None):
    """x: (B, H*W, C); gamma/beta: (4C,); w_red: (2C, 4C) = nn.Linear(4C, 2C).weight.

    mxu_dtype: optional dtype for the MXU operands (e.g. jnp.bfloat16 to keep
    f32-activation models HBM-bound on v5e/v6e).  Default: x.dtype.
    """
    H, W = input_resolution
    B, L, C = x.shape
    assert L == H * W, "input feature has wrong size"
    assert H % 2 == 0 and W % 2 == 0, "x size is not even"
    Hh, Wh = H // 2, W // 2
    N = 2 * C
    two_c = 2 * C
    M = B * Hh * Wh
    num_rc = B * Hh

    # Metadata-only reshape: (B, H*W, C) -> (B*Hh, 2, Wh, 2C)
    #   axis 0: (b, i) downsampled row;  axis 1: row parity p (h = 2i + p)
    #   axis 2: j downsampled column;    axis 3: [x[b,2i+p,2j,:] | x[b,2i+p,2j+1,:]]
    x4 = x.reshape(num_rc, 2, Wh, two_c)

    # Fold the LayerNorm affine into the reduction weight / output bias (f32, one-time).
    wt = jnp.transpose(w_red).astype(jnp.float32)            # (4C, 2C);  y = x @ W^T
    w_fold = gamma.astype(jnp.float32)[:, None] * wt
    # torch concat order [x0, x1, x2, x3] = [(ev,ev), (odd,ev), (ev,odd), (odd,odd)]:
    #   even-row operand carries [x0 | x2] -> stack [W0; W2]
    #   odd-row  operand carries [x1 | x3] -> stack [W1; W3]
    w_dt = mxu_dtype if mxu_dtype is not None else x.dtype
    w_even = jnp.concatenate([w_fold[0:C], w_fold[2 * C:3 * C]], axis=0).astype(w_dt)
    w_odd = jnp.concatenate([w_fold[C:2 * C], w_fold[3 * C:4 * C]], axis=0).astype(w_dt)
    bias = (beta.astype(jnp.float32) @ wt).reshape(1, N)      # stays f32 (added to f32 acc)

    # Hardware-aware tiling parameters.
    vmem_phys = _tpu_vmem_capacity_bytes()
    small_vmem = vmem_phys <= 64 * 1024 * 1024        # v7x-class: 64 MiB / TC, 2 TCs
    if small_vmem:
        vmem_budget = 28 * 1024 * 1024
        vmem_limit_cap = 48 * 1024 * 1024             # leave headroom in 64 MiB
        min_steps = 2                                 # feed both TensorCores
        default_rows = 1024
    else:                                              # v5e / v6e: 128 MiB VMEM
        vmem_budget = 80 * 1024 * 1024
        vmem_limit_cap = 100 * 1024 * 1024
        min_steps = 1
        default_rows = 2048
    tr = target_rows if target_rows is not None else default_rows

    x_bytes = jnp.dtype(x.dtype).itemsize
    w_bytes = jnp.dtype(w_even.dtype).itemsize
    bt, vmem_est = _pick_block_rows(num_rc, Wh, two_c, N, x_bytes, w_bytes,
                                    target_rows=tr, vmem_budget=vmem_budget,
                                    min_steps=min_steps)
    rows = bt * Wh
    grid = (num_rc // bt,)
    vmem_limit = int(min(max(vmem_est * 3 // 2, 32 * 1024 * 1024), vmem_limit_cap))
    vmem_limit = max(vmem_limit, vmem_est + 4 * 1024 * 1024)   # never below the estimate

    out = pl.pallas_call(
        _patch_merging_kernel,
        out_shape=jax.ShapeDtypeStruct((M, N), x.dtype),
        grid=grid,
        in_specs=[
            # One contiguous (bt, 2, Wh, 2C) block per step; parity split is a
            # static slice inside the kernel (no strided parity DMA streams).
            pl.BlockSpec((bt, 2, Wh, two_c), lambda g: (g, 0, 0, 0)),
            # Grid-invariant operands: constant index_map -> fetched once.
            pl.BlockSpec((two_c, N), lambda g: (0, 0)),
            pl.BlockSpec((two_c, N), lambda g: (0, 0)),
            pl.BlockSpec((1, N), lambda g: (0, 0)),
        ],
        out_specs=pl.BlockSpec((rows, N), lambda g: (g, 0)),   # lane-dense (2C-wide) stores
        compiler_params=pltpu.CompilerParams(
            dimension_semantics=("parallel",),
            vmem_limit_bytes=vmem_limit,
        ),
    )(x4, w_even, w_odd, bias)

    return out.reshape(B, Hh * Wh, N)


def patch_merging_ref(x, gamma, beta, w_red, input_resolution):
    """Pure-JAX reference mirroring the PyTorch forward (f32, HIGHEST precision)."""
    H, W = input_resolution
    B, L, C = x.shape
    xv = x.astype(jnp.float32).reshape(B, H, W, C)
    x0 = xv[:, 0::2, 0::2, :]
    x1 = xv[:, 1::2, 0::2, :]
    x2 = xv[:, 0::2, 1::2, :]
    x3 = xv[:, 1::2, 1::2, :]
    xc = jnp.concatenate([x0, x1, x2, x3], axis=-1).reshape(B, -1, 4 * C)
    mean = jnp.mean(xc, axis=-1, keepdims=True)
    var = jnp.mean((xc - mean) ** 2, axis=-1, keepdims=True)
    xn = (xc - mean) / jnp.sqrt(var + LN_EPS)
    xn = xn * gamma + beta
    return jnp.matmul(xn, jnp.transpose(w_red).astype(jnp.float32),
                      precision=lax.Precision.HIGHEST)


if __name__ == "__main__":
    # Small demo: C=64 so 4C=256 and 2C=128 (lane-dense input/output), H=W=16, B=2.
    B, H, W, C = 2, 16, 16, 64
    key = jax.random.PRNGKey(0)
    kx, kw, kg, kb = jax.random.split(key, 4)

    x = jax.random.normal(kx, (B, H * W, C), dtype=jnp.float32)
    gamma = 1.0 + 0.1 * jax.random.normal(kg, (4 * C,), dtype=jnp.float32)   # LN weight
    beta = 0.1 * jax.random.normal(kb, (4 * C,), dtype=jnp.float32)          # LN bias
    w_red = 0.02 * jax.random.normal(kw, (2 * C, 4 * C), dtype=jnp.float32)  # Linear weight

    ref = patch_merging_ref(x, gamma, beta, w_red, (H, W))

    # 1) Default tiling (hardware-aware tile picker).
    out = jax.block_until_ready(patch_merging_pallas(x, gamma, beta, w_red, (H, W)))
    assert out.shape == (B, (H // 2) * (W // 2), 2 * C)
    assert jnp.allclose(out, ref, atol=1e-3, rtol=1e-3), float(jnp.max(jnp.abs(out - ref)))

    # 2) Smaller row tile to exercise the multi-step grid / index_maps.
    out2 = jax.block_until_ready(
        patch_merging_pallas(x, gamma, beta, w_red, (H, W), target_rows=64))
    assert jnp.allclose(out2, ref, atol=1e-3, rtol=1e-3), float(jnp.max(jnp.abs(out2 - ref)))

    # 3) bf16-MXU-operand policy for f32 activations (v5e/v6e perf path).
    out3 = jax.block_until_ready(
        patch_merging_pallas(x, gamma, beta, w_red, (H, W), mxu_dtype=jnp.bfloat16))
    assert jnp.allclose(out3, ref, atol=2e-2, rtol=2e-2), float(jnp.max(jnp.abs(out3 - ref)))

    # 4) bf16 activation path (bf16 inputs, bf16 weights, f32 LN/accumulation).
    xb = x.astype(jnp.bfloat16)
    outb = jax.block_until_ready(patch_merging_pallas(xb, gamma, beta, w_red, (H, W)))
    assert outb.dtype == jnp.bfloat16
    errb = float(jnp.max(jnp.abs(outb.astype(jnp.float32) - ref)))
    assert jnp.allclose(outb.astype(jnp.float32), ref, atol=3e-2, rtol=3e-2), errb

    print("KERNEL_OK")
</pallas_src>

<mosaic_0001>
module attributes {stable_mosaic.version = 11 : i64} {
  func.func @_patch_merging_kernel(%arg0: i32, %arg1: memref<8x2x8x128xf32, #tpu.memory_space<vmem>>, %arg2: memref<128x128xf32, #tpu.memory_space<vmem>>, %arg3: memref<128x128xf32, #tpu.memory_space<vmem>>, %arg4: memref<1x128xf32, #tpu.memory_space<vmem>>, %arg5: memref<64x128xf32, #tpu.memory_space<vmem>>) attributes {dimension_semantics = [#tpu.dimension_semantics<parallel>], iteration_bounds = array<i64: 2>, scalar_prefetch = 0 : i64, scratch_operands = 0 : i64, tpu.core_type = #tpu.core_type<tc>, window_params = [{transform_indices = @transform_0, window_bounds = array<i64: 8, 2, 8, 128>}, {pipeline_mode = #tpu.pipeline_mode<synchronous>, transform_indices = @transform_1, window_bounds = array<i64: 128, 128>}, {pipeline_mode = #tpu.pipeline_mode<synchronous>, transform_indices = @transform_2, window_bounds = array<i64: 128, 128>}, {pipeline_mode = #tpu.pipeline_mode<synchronous>, transform_indices = @transform_3, window_bounds = array<i64: 1, 128>}, {transform_indices = @transform_4, window_bounds = array<i64: 64, 128>}]} {
    %c0 = arith.constant 0 : index
    %c0_0 = arith.constant 0 : index
    %c0_1 = arith.constant 0 : index
    %c0_2 = arith.constant 0 : index
    %0 = vector.load %arg1[%c0, %c0_0, %c0_1, %c0_2] : memref<8x2x8x128xf32, #tpu.memory_space<vmem>>, vector<8x1x8x128xf32>
    %1 = vector.shape_cast %0 : vector<8x1x8x128xf32> to vector<8x8x128xf32>
    %2 = vector.shape_cast %1 : vector<8x8x128xf32> to vector<64x128xf32>
    %c0_3 = arith.constant 0 : index
    %c1 = arith.constant 1 : index
    %c0_4 = arith.constant 0 : index
    %c0_5 = arith.constant 0 : index
    %3 = vector.load %arg1[%c0_3, %c1, %c0_4, %c0_5] : memref<8x2x8x128xf32, #tpu.memory_space<vmem>>, vector<8x1x8x128xf32>
    %4 = vector.shape_cast %3 : vector<8x1x8x128xf32> to vector<8x8x128xf32>
    %5 = vector.shape_cast %4 : vector<8x8x128xf32> to vector<64x128xf32>
    %cst = arith.constant dense<0.000000e+00> : vector<64xf32>
    %6 = vector.multi_reduction <add>, %2, %cst [1] : vector<64x128xf32> to vector<64xf32>
    %7 = vector.shape_cast %6 : vector<64xf32> to vector<64x1xf32>
    %cst_6 = arith.constant dense<0.000000e+00> : vector<64xf32>
    %8 = vector.multi_reduction <add>, %5, %cst_6 [1] : vector<64x128xf32> to vector<64xf32>
    %9 = vector.shape_cast %8 : vector<64xf32> to vector<64x1xf32>
    %10 = arith.addf %7, %9 : vector<64x1xf32>
    %cst_7 = arith.constant 3.906250e-03 : f32
    %11 = vector.broadcast %cst_7 : f32 to vector<64x1xf32>
    %12 = arith.mulf %10, %11 : vector<64x1xf32>
    %13 = vector.broadcast %12 : vector<64x1xf32> to vector<64x128xf32>
    %14 = arith.subf %2, %13 : vector<64x128xf32>
    %15 = vector.broadcast %12 : vector<64x1xf32> to vector<64x128xf32>
    %16 = arith.subf %5, %15 : vector<64x128xf32>
    %17 = arith.mulf %14, %14 : vector<64x128xf32>
    %cst_8 = arith.constant dense<0.000000e+00> : vector<64xf32>
    %18 = vector.multi_reduction <add>, %17, %cst_8 [1] : vector<64x128xf32> to vector<64xf32>
    %19 = vector.shape_cast %18 : vector<64xf32> to vector<64x1xf32>
    %20 = arith.mulf %16, %16 : vector<64x128xf32>
    %cst_9 = arith.constant dense<0.000000e+00> : vector<64xf32>
    %21 = vector.multi_reduction <add>, %20, %cst_9 [1] : vector<64x128xf32> to vector<64xf32>
    %22 = vector.shape_cast %21 : vector<64xf32> to vector<64x1xf32>
    %23 = arith.addf %19, %22 : vector<64x1xf32>
    %cst_10 = arith.constant 3.906250e-03 : f32
    %24 = vector.broadcast %cst_10 : f32 to vector<64x1xf32>
    %25 = arith.mulf %23, %24 : vector<64x1xf32>
    %cst_11 = arith.constant 9.99999974E-6 : f32
    %26 = vector.broadcast %cst_11 : f32 to vector<64x1xf32>
    %27 = arith.addf %25, %26 : vector<64x1xf32>
    %28 = math.rsqrt %27 : vector<64x1xf32>
    %29 = vector.broadcast %28 : vector<64x1xf32> to vector<64x128xf32>
    %30 = arith.mulf %14, %29 : vector<64x128xf32>
    %31 = vector.broadcast %28 : vector<64x1xf32> to vector<64x128xf32>
    %32 = arith.mulf %16, %31 : vector<64x128xf32>
    %c0_12 = arith.constant 0 : index
    %c0_13 = arith.constant 0 : index
    %33 = vector.load %arg2[%c0_12, %c0_13] : memref<128x128xf32, #tpu.memory_space<vmem>>, vector<128x128xf32>
    %cst_14 = arith.constant dense<0.000000e+00> : vector<64x128xf32>
    %34 = tpu.matmul %30, %33, %cst_14 {dimension_numbers = #tpu.dot_dimension_numbers<[1], [0], [0], [1], [0, 0, 1, 1], [], []>} : vector<64x128xf32>, vector<128x128xf32>, vector<64x128xf32> -> vector<64x128xf32>
    %c0_15 = arith.constant 0 : index
    %c0_16 = arith.constant 0 : index
    %35 = vector.load %arg3[%c0_15, %c0_16] : memref<128x128xf32, #tpu.memory_space<vmem>>, vector<128x128xf32>
    %cst_17 = arith.constant dense<0.000000e+00> : vector<64x128xf32>
    %36 = tpu.matmul %32, %35, %cst_17 {dimension_numbers = #tpu.dot_dimension_numbers<[1], [0], [0], [1], [0, 0, 1, 1], [], []>} : vector<64x128xf32>, vector<128x128xf32>, vector<64x128xf32> -> vector<64x128xf32>
    %37 = arith.addf %34, %36 : vector<64x128xf32>
    %c0_18 = arith.constant 0 : index
    %c0_19 = arith.constant 0 : index
    %38 = vector.load %arg4[%c0_18, %c0_19] : memref<1x128xf32, #tpu.memory_space<vmem>>, vector<1x128xf32>
    %39 = vector.broadcast %38 : vector<1x128xf32> to vector<64x128xf32>
    %40 = arith.addf %37, %39 : vector<64x128xf32>
    %c0_20 = arith.constant 0 : index
    %c0_21 = arith.constant 0 : index
    %41 = vector.load %arg5[%c0_20, %c0_21] : memref<64x128xf32, #tpu.memory_space<vmem>>, vector<64x128xf32>
    tpu.vector_store %arg5[%c0_20, %c0_21], %40 {strides = array<i32>} : memref<64x128xf32, #tpu.memory_space<vmem>>, vector<64x128xf32>,
    return
  }
  func.func @transform_0(%arg0: i32) -> (i32, i32, i32, i32) {
    %c0_i32 = arith.constant 0 : i32
    %c0_i32_0 = arith.constant 0 : i32
    %c0_i32_1 = arith.constant 0 : i32
    %c0_i32_2 = arith.constant 0 : i32
    return %arg0, %c0_i32, %c0_i32_0, %c0_i32_1 : i32, i32, i32, i32
  }
  func.func @transform_1(%arg0: i32) -> (i32, i32) {
    %c0_i32 = arith.constant 0 : i32
    %c0_i32_0 = arith.constant 0 : i32
    %c0_i32_1 = arith.constant 0 : i32
    return %c0_i32, %c0_i32_0 : i32, i32
  }
  func.func @transform_2(%arg0: i32) -> (i32, i32) {
    %c0_i32 = arith.constant 0 : i32
    %c0_i32_0 = arith.constant 0 : i32
    %c0_i32_1 = arith.constant 0 : i32
    return %c0_i32, %c0_i32_0 : i32, i32
  }
  func.func @transform_3(%arg0: i32) -> (i32, i32) {
    %c0_i32 = arith.constant 0 : i32
    %c0_i32_0 = arith.constant 0 : i32
    %c0_i32_1 = arith.constant 0 : i32
    return %c0_i32, %c0_i32_0 : i32, i32
  }
  func.func @transform_4(%arg0: i32) -> (i32, i32) {
    %c0_i32 = arith.constant 0 : i32
    %c0_i32_0 = arith.constant 0 : i32
    return %arg0, %c0_i32 : i32, i32
  }
}

</mosaic_0001>

<bundles_post_ra>
// kernel: tpu_custom_call.1
= control target key start
LH: loop header
LB: loop body
LE: loop exit
PB: predicated region body
PF: predicated region fallthrough
CT: control target
= control target key end

     0   :  { %9 = vsyncpa [#allocation3], 0  ;;  %s1595_s0 = inlined_call_operand.hbm [shape: f32[16,2,8,128], index: 0, kind: input, shape index: {}]   ;;  %s1596_s1 = inlined_call_operand.hbm [shape: f32[128,128], index: 1, kind: input, shape index: {}]   ;;  %s1597_s2 = inlined_call_operand.hbm [shape: f32[128,128], index: 2, kind: input, shape index: {}]   ;;  %s1598_s3 = inlined_call_operand.vmem [shape: f32[1,128], index: 3, kind: input, shape index: {}]   ;;  %s1599_s4 = inlined_call_operand.hbm [shape: f32[128,128], index: 4, kind: output, shape index: {}]  }
   0x1   :  { %11 = vsyncpa [#allocation3 + $0x1], 0 }
   0x2   :  { %12 = vsyncpa [#allocation6], 0 }
   0x3   :  { %13 = vsyncpa [#allocation4], 0 }
   0x4   :  { %15 = vsyncpa [#allocation4 + $0x1], 0  ;;  %s1233_s15 = smov 0   ;;  %s1235_s16 = smov 0  }
   0x5   :  { %s1237_s17 = smov 0   ;;  %s1239_s18 = smov 0  }
   0x6 LB: > { %s1254_s19 = sadd.s32 4294967295, %s1198_s18   ;;  %s796_s20 = sadd.s32 4294967294, %s1198_s18   ;;  %s1198_s18 = sphi %s1239_s18, %s1620_s18   ;;  %s1194_s17 = sphi %s1237_s17, %s1619_s17   ;;  %s1190_s16 = sphi %s1235_s16, %s1618_s16   ;;  %s1186_s15 = sphi %s1233_s15, %s1617_s15  }
   0x7   : > { %p41_p0 = scmp.ne.s32.totalorder %s1190_s16, %s1186_s15  ;;  %p1600_p1 = scmp.eq.s32.totalorder %s1254_s19, 0 }
   0x8   : > { %p128_p2 = scmp.eq.s32.totalorder %s1254_s19, 1  ;;  %p134_p3 = scmp.eq.s32.totalorder %s796_s20, 1 }
   0x9   : > { %p1263_p4 = por %p1600_p1, %p41_p0  ;;  %p797_p5 = scmp.ge.s32.totalorder %s1198_s18, 1 }
   0xa   : > { %p1268_p6 = por %p134_p3, %p41_p0  ;;  %p141_p7 = scmp.lt.s32.totalorder %s1198_s18, 3 }
   0xb   : > { %s1604_s21 = scalar_select %p1263_p4, 1, 0 }
   0xc   : > { %s1605_s22 = scalar_select %p1268_p6, 1, 0 }
   0xd   : > { %p1273_p8 = pnand %p797_p5, %p141_p7  ;;  %s1200_s24 = smov [#allocation5]  }
   0xe   : > { %s153_s25 = sshll.u32 %s1200_s24, 4  ;;  %s1201_s27 = smov [#allocation7]   ;;  %s154_s25 = int_to_ptr.vmem [resolvable:$true] %s153_s25 }
   0xf   : > { %s1606_s23 = scalar_select %p1273_p8, 1, 0 }
  0x10   : > { %p975_p9 = pneg %p1273_p8  ;;  %s166_s28 = sshll.u32 %s1201_s27, 4  ;;  %s167_s28 = int_to_ptr.vmem [resolvable:$true] %s166_s28 }
  0x11   : > { %s1061_s29 = scalar_lea.vmem %s154_s25, 2048  ;;  %p1069_p5 = scmp.lt.s32.totalorder %s154_s25, %s154_s25 }
  0x12   : > { %p1282_p11 = pnand %p975_p9, %p1600_p1  ;;  %p1062_p13 = scmp.ne.s32.totalorder %s154_s25, %s1061_s29 }
  0x13   : > { %p1070_p7 = scmp.lt.s32.totalorder %s1061_s29, %s1061_s29 }
  0x14   : > { %p1052_p12 = pneg %p1282_p11 }
  0x15   : > { %p1071_p10 = por %p1070_p7, %p1069_p5 }
  0x16   : > { %p1064_p0 = pnand %p1062_p13, %p1052_p12 }
  0x18   : > { %p1065_p3 = pneg %p1064_p0 }
  0x1a   : > { %p1072_p9 = pnand %p1071_p10, %p1065_p3 }
  0x1c   : > { %1075 = shalt.err (!%p1072_p9)
}
  0x1d   : > { %s1202_s30 = smov 128   ;;  %s1203_s5 = smov 8  }
  0x1e   : > { %978 = dma.hbm_to_vmem [thread:$0]  (!%p1282_p11), %s1596_s1, 2048, %s154_s25, [#allocation6], %s1202_s30, %s1202_s30, %s1203_s5  }
  0x1f   : > { %s1087_s8 = scalar_lea.vmem %s167_s28, 2048  ;;  %p1095_p10 = scmp.lt.s32.totalorder %s167_s28, %s167_s28 }
  0x20   : > { %p1088_p13 = scmp.ne.s32.totalorder %s167_s28, %s1087_s8  ;;  %p1096_p3 = scmp.lt.s32.totalorder %s1087_s8, %s1087_s8 }
  0x22   : > { %p1090_p0 = pnand %p1088_p13, %p1052_p12  ;;  %p1097_p7 = por %p1096_p3, %p1095_p10 }
  0x24   : > { %p1091_p5 = pneg %p1090_p0 }
  0x26   : > { %p1098_p9 = pnand %p1097_p7, %p1091_p5 }
  0x28   : > { %1101 = shalt.err (!%p1098_p9)
}
  0x29   : > { %981 = dma.hbm_to_vmem [thread:$0]  (!%p1282_p11), %s1597_s2, 2048, %s167_s28, [#allocation6], %s1202_s30, %s1202_s30, %s1203_s5  }
  0x2a   : > { %s1311_s11 = sadd.s32 1, %s1198_s18   ;;  %s28_s12 = sadd.s32 1, %s1194_s17 }
  0x2b   : > { %s25_s13 = ssub.s32 %s1198_s18, %s1311_s11  ;;  %p35_p12 = scmp.ne.s32.totalorder %s1194_s17, %s1190_s16 }
  0x2c   : > { %p26_p13 = scmp.eq.s32.totalorder %s25_s13, 0  ;;  %p36_p0 = scmp.eq.s32.totalorder %s1198_s18, 0 }
  0x2d   : > { %p1321_p5 = por %p128_p2, %p35_p12  ;;  %p992_p10 = scmp.lt.s32.totalorder %s1198_s18, 2 }
  0x2e   : > { %s1327_s20 = scalar_select %p26_p13, %s1194_s17, %s28_s12  }
  0x2f   : > { %s1608_s14 = scalar_select %p1321_p5, 1, 0 }
  0x30   : > { %p37_p3 = por %p36_p0, %p35_p12  ;;  %s183_s24 = sand.u32 1, %s1194_s17  }
  0x31   : > { %s801_s25 = sshll.u32 %s183_s24, 7  ;;  %s825_s26 = sshll.u32 %s1198_s18, 11 }
  0x32   : > { %s1334_s29 = scalar_lea.hbm %s1595_s0, %s825_s26  ;;  %s187_s6 = scalar_lea.vmem [#allocation2], %s801_s25 }
  0x33   : > { %s195_s7 = sshll.u32 %s187_s6, 4  ;;  %p1338_p2 = pnand %p992_p10, %p37_p3  ;;  %s1336_s7 = int_to_ptr.vmem [resolvable:$true] %s195_s7 }
  0x34   : > { %s1342_s9 = scalar_lea.sflag [#allocation3], %s183_s24  ;;  %s1102_s10 = scalar_lea.hbm %s1334_s29, 2048 }
  0x35   : > { %p1103_p11 = scmp.ne.s32.totalorder %s1334_s29, %s1102_s10  ;;  %p1104_p7 = pneg %p1338_p2 }
  0x36   : > { %s1107_s25 = scalar_lea.hbm %s1595_s0, 4096  ;;  %p1108_p13 = scmp.lt.s32.totalorder %s1334_s29, %s1595_s0 }
  0x37   : > { %p1105_p9 = pnand %p1104_p7, %p1103_p11  ;;  %p1109_p0 = scmp.lt.s32.totalorder %s1107_s25, %s1102_s10 }
  0x39   : > { %p1106_p12 = pneg %p1105_p9  ;;  %p1110_p10 = por %p1109_p0, %p1108_p13 }
  0x3b   : > { %p1111_p3 = pnand %p1110_p10, %p1106_p12 }
  0x3d   : > { %1114 = shalt.err (!%p1111_p3)
}
  0x3e   : > { %s1115_s24 = scalar_lea.vmem %s1336_s7, 2048  ;;  %s1204_s28 = smov [#allocation2]  }
  0x3f   : > { %p1116_p1 = scmp.ne.s32.totalorder %s1336_s7, %s1115_s24  ;;  %s1120_s6 = sshll.u32 %s1204_s28, 4  ;;  %s1121_s6 = int_to_ptr.vmem [resolvable:$false] %s1120_s6 }
  0x40   : > { %s1122_s12 = scalar_lea.vmem %s1121_s6, 4096  ;;  %p1123_p9 = scmp.lt.s32.totalorder %s1336_s7, %s1121_s6 }
  0x41   : > { %p1118_p6 = pnand %p1116_p1, %p1104_p7  ;;  %p1124_p5 = scmp.lt.s32.totalorder %s1122_s12, %s1115_s24 }
  0x43   : > { %p1119_p11 = pneg %p1118_p6  ;;  %p1125_p4 = por %p1124_p5, %p1123_p9 }
  0x45   : > { %p1126_p8 = pnand %p1125_p4, %p1119_p11 }
  0x47   : > { %1129 = shalt.err (!%p1126_p8)
}
  0x48   : > { %985 = dma.hbm_to_vmem [thread:$0]  (!%p1338_p2), %s1334_s29, 2048, %s1336_s7, %s1342_s9, %s1202_s30, %s1202_s30, %s1203_s5  }
  0x49   : > { %p1610_p1 = scmp.ne.s32.totalorder %s1606_s23, 0 }
  0x4a   : > { %s1369_s10 = sand.u32 (!%p1610_p1), 1, %s1190_s16   ;;  %p1611_p4 = scmp.ne.s32.totalorder (!%p1610_p1), %s1604_s21, 0 }
  0x4b   : > { %207 = sbr.rel (%p1610_p1) target bundleno = 637 (0x27d), region = 36  ;;  %s806_s13 = sshll.u32 (!%p1610_p1), %s1369_s10, 7 }
  0x4c   : > { %s210_s25 = scalar_lea.sflag (!%p1610_p1), [#allocation3], %s1369_s10  ;;  %s1373_s26 = scalar_lea.vmem (!%p1610_p1), [#allocation2], %s806_s13 }
  0x50   : > { %1173 = dma.done.wait (%p1611_p4), %s210_s25, 2048  }
  0x51   : > { %1175 = vsyncadd (%p1611_p4), %s210_s25, 4294965248  ;;  %p1612_p6 = scmp.eq.s32.totalorder %s1254_s19, 0 }
  0x53   : > { %1177 = dma.done.wait (%p1612_p6), [#allocation6], 4096   ;;  %p1613_p8 = pmov %p1612_p6 }
  0x54   : > { %v1384_v0 = vld [vmem:[%s1373_s26 + $0x10] sm:$0xff]  ;;  %v248_v1 = vld [vmem:[%s1373_s26] sm:$0xff]  ;;  %v811_v2 = vld [vmem:[%s1373_s26 + $0x18] sm:$0xff]  ;;  %s809_s21 = sshll.u32 %s1369_s10, 6  ;;  %s826_s7 = sshll.u32 %s1254_s19, 10 }
  0x55   : > { %1179 = vsyncadd (%p1613_p8), [#allocation6], 4294963200  ;;  %267 = vadd.xlane.f32.xlu1 %v1384_v0  ;;  %265 = vadd.xlane.f32.xlu0 %v248_v1  ;;  %v810_v3 = vld [vmem:[%s1373_s26 + $0x8] sm:$0xff]  ;;  %v1394_v5 = vld [vmem:[%s1373_s26 + $0x20] sm:$0xff]  ;;  %s1535_s5 = scalar_lea.vmem [#allocation8], %s809_s21  ;;  %s1550_s27 = scalar_lea.hbm %s1599_s4, %s826_s7 }
  0x56   : > { %v1391_v4 = vld [vmem:[%s1373_s26 + $0x28] sm:$0xff]  ;;  %v1399_v6 = vld [vmem:[%s1373_s26 + $0x38] sm:$0xff]  ;;  %v1402_v7 = vld [vmem:[%s1373_s26 + $0x30] sm:$0xff]  ;;  %s704_s29 = sshll.u32 %s1535_s5, 4  ;;  %s691_s24 = scalar_lea.sflag [#allocation4], %s1369_s10  ;;  %s1545_s29 = int_to_ptr.vmem [resolvable:$true] %s704_s29 }
  0x57   : > { %v1407_v8 = vld [vmem:[%s1373_s26 + $0x48] sm:$0xff]  ;;  %v1410_v9 = vld [vmem:[%s1373_s26 + $0x40] sm:$0xff]  ;;  %v1415_v10 = vld [vmem:[%s1373_s26 + $0x58] sm:$0xff]  ;;  %s1130_s28 = scalar_lea.vmem %s1545_s29, 1024  ;;  %p1614_p2 = scmp.ne.s32.totalorder %s1608_s14, 0 }
  0x58   : > { %v1418_v11 = vld [vmem:[%s1373_s26 + $0x50] sm:$0xff]  ;;  %v1423_v12 = vld [vmem:[%s1373_s26 + $0x68] sm:$0xff]  ;;  %v1426_v13 = vld [vmem:[%s1373_s26 + $0x60] sm:$0xff]  ;;  %p1131_p5 = scmp.ne.s32.totalorder %s1545_s29, %s1130_s28  ;;  %s1205_s19 = smov [#allocation8]  }
  0x59   : > { %283 = vadd.xlane.f32.xlu1 %v811_v2  ;;  %281 = vadd.xlane.f32.xlu0 %v810_v3  ;;  %v1431_v14 = vld [vmem:[%s1373_s26 + $0x78] sm:$0xff]  ;;  %v1434_v15 = vld [vmem:[%s1373_s26 + $0x70] sm:$0xff]  ;;  %v454_v20 = vld [vmem:[#allocation7 + $0x68] sm:$0xff]  ;;  %s1134_s6 = sshll.u32 %s1205_s19, 4  ;;  %s1135_s6 = int_to_ptr.vmem [resolvable:$false] %s1134_s6 }
  0x5a   : > { %v456_v16 = vld [vmem:[#allocation7 + $0x78] sm:$0xff]  ;;  %v455_v18 = vld [vmem:[#allocation7 + $0x70] sm:$0xff]  ;;  %v438_v21 = vld [vmem:[#allocation5 + $0x68] sm:$0xff]  ;;  %p1132_p7 = pnand %p1131_p5, %p1614_p2  ;;  %s1136_s12 = scalar_lea.vmem %s1135_s6, 2048 }
  0x5b   : > { %v440_v17 = vld [vmem:[#allocation5 + $0x78] sm:$0xff]  ;;  %875 = vmatprep.subr.mxu0 %v456_v16  ;;  %v439_v19 = vld [vmem:[#allocation5 + $0x70] sm:$0xff]  ;;  %v453_v63 = vld [vmem:[#allocation7 + $0x60] sm:$0xff]  ;;  %p1137_p13 = scmp.lt.s32.totalorder %s1545_s29, %s1135_s6  ;;  %p1138_p0 = scmp.lt.s32.totalorder %s1136_s12, %s1130_s28 }
  0x5c   : > { %919 = vmatprep.subr.mxu1 %v440_v17  ;;  %876 = vmatpush3.msra.mxu0 %v456_v16  ;;  %p1133_p12 = pneg %p1132_p7 }
  0x5d   : > { %285 = vadd.xlane.f32.xlu1 %v1391_v4  ;;  %269 = vadd.xlane.f32.xlu0 %v1394_v5  ;;  %p1139_p10 = por %p1138_p0, %p1137_p13 }
  0x5e   : > { %920 = vmatpush3.msra.mxu1 %v440_v17  ;;  %877 = vmatprep.subr.mxu0 %v455_v18  ;;  %v451_v17 = vld [vmem:[#allocation7 + $0x50] sm:$0xff] }
  0x5f   : > { %921 = vmatprep.subr.mxu1 %v439_v19  ;;  %878 = vmatpush3.msra.mxu0 %v455_v18  ;;  %v435_v18 = vld [vmem:[#allocation5 + $0x50] sm:$0xff]  ;;  %p1140_p3 = pnand %p1139_p10, %p1133_p12 }
  0x60   : > { %922 = vmatpush3.msra.mxu1 %v439_v19  ;;  %879 = vmatprep.subr.mxu0 %v454_v20 }
  0x61   : > { %287 = vadd.xlane.f32.xlu1 %v1399_v6  ;;  %271 = vadd.xlane.f32.xlu0 %v1402_v7 }
  0x62   : > { %923 = vmatprep.subr.mxu1 %v438_v21  ;;  %880 = vmatpush3.msra.mxu0 %v454_v20 }
  0x63   : > { %924 = vmatpush3.msra.mxu1 %v438_v21  ;;  %881 = vmatprep.subr.mxu0 %v453_v63 }
  0x64   : > { %882 = vmatpush3.msra.mxu0 %v453_v63 }
  0x65   : > { %289 = vadd.xlane.f32.xlu1 %v1407_v8  ;;  %273 = vadd.xlane.f32.xlu0 %v1410_v9 }
  0x69   : > { %291 = vadd.xlane.f32.xlu1 %v1415_v10  ;;  %275 = vadd.xlane.f32.xlu0 %v1418_v11 }
  0x6d   : > { %293 = vadd.xlane.f32.xlu1 %v1423_v12  ;;  %277 = vadd.xlane.f32.xlu0 %v1426_v13 }
  0x71   : > { %295 = vadd.xlane.f32.xlu1 %v1431_v14  ;;  %279 = vadd.xlane.f32.xlu0 %v1434_v15 }
  0xde   : > { %v268_v22 = vpop.xlane.xlu1 %267  ;;  %v266_v23 = vpop.xlane.xlu0 %265 }
  0xe2   : > { %v284_v24 = vpop.xlane.xlu1 %283  ;;  %v282_v25 = vpop.xlane.xlu0 %281 }
  0xe3   : > { %v298_v26 = vadd.f32 %v284_v24, %v268_v22  ;;  %v297_v27 = vadd.f32 %v282_v25, %v266_v23  ;;  %v434_v23 = vld [vmem:[#allocation5 + $0x48] sm:$0xff] }
  0xe5   : > { %v306_v28 = vmul.f32 0.00390625, %v298_v26  ;;  %v305_v29 = vmul.f32 0.00390625, %v297_v27 }
  0xe6   : > { %v286_v30 = vpop.xlane.xlu1 %285  ;;  %v270_v31 = vpop.xlane.xlu0 %269 }
  0xe7   : > { %v1438_v32 = vsub.f32 %v248_v1, %v305_v29  ;;  %v1440_v33 = vsub.f32 %v810_v3, %v305_v29  ;;  %v299_v34 = vadd.f32 %v286_v30, %v270_v31  ;;  %v1443_v35 = vsub.f32 %v1384_v0, %v306_v28  ;;  %v437_v0 = vld [vmem:[#allocation5 + $0x60] sm:$0xff] }
  0xe8   : > { %v1445_v36 = vsub.f32 %v811_v2, %v306_v28  ;;  %925 = vmatprep.subr.mxu1 %v437_v0  ;;  %v449_v28 = vld [vmem:[#allocation7 + $0x40] sm:$0xff] }
  0xe9   : > { %v353_v37 = vmul.f32 %v1440_v33, %v1440_v33  ;;  %v329_v38 = vmul.f32 %v1438_v32, %v1438_v32  ;;  %v307_v39 = vmul.f32 0.00390625, %v299_v34  ;;  %v330_v47 = vmul.f32 %v1443_v35, %v1443_v35  ;;  %926 = vmatpush3.msra.mxu1 %v437_v0  ;;  %v433_v29 = vld [vmem:[#allocation5 + $0x40] sm:$0xff]  ;;  %v448_v34 = vld [vmem:[#allocation7 + $0x38] sm:$0xff] }
  0xea   : > { %v288_v40 = vpop.xlane.xlu1 %287  ;;  %v272_v41 = vpop.xlane.xlu0 %271  ;;  %v354_v46 = vmul.f32 %v1445_v36, %v1445_v36 }
  0xeb   : > { %361 = vadd.xlane.f32.xlu1 %v353_v37  ;;  %337 = vadd.xlane.f32.xlu0 %v329_v38  ;;  %v300_v42 = vadd.f32 %v288_v40, %v272_v41  ;;  %v1452_v43 = vsub.f32 %v1394_v5, %v307_v39  ;;  %v1455_v44 = vsub.f32 %v1391_v4, %v307_v39  ;;  %v432_v37 = vld [vmem:[#allocation5 + $0x38] sm:$0xff]  ;;  %v447_v38 = vld [vmem:[#allocation7 + $0x30] sm:$0xff]  ;;  %v446_v40 = vld [vmem:[#allocation7 + $0x28] sm:$0xff] }
  0xec   : > { %v431_v39 = vld [vmem:[#allocation5 + $0x30] sm:$0xff]  ;;  %v430_v41 = vld [vmem:[#allocation5 + $0x28] sm:$0xff] }
  0xed   : > { %v308_v45 = vmul.f32 0.00390625, %v300_v42  ;;  %v355_v50 = vmul.f32 %v1455_v44, %v1455_v44  ;;  %v331_v51 = vmul.f32 %v1452_v43, %v1452_v43  ;;  %v445_v42 = vld [vmem:[#allocation7 + $0x20] sm:$0xff] }
  0xee   : > { %v290_v48 = vpop.xlane.xlu1 %289  ;;  %v274_v49 = vpop.xlane.xlu0 %273 }
  0xef   : > { %v1466_v52 = vsub.f32 %v1402_v7, %v308_v45  ;;  %v1469_v53 = vsub.f32 %v1399_v6, %v308_v45  ;;  %363 = vadd.xlane.f32.xlu1 %v354_v46  ;;  %339 = vadd.xlane.f32.xlu0 %v330_v47  ;;  %v301_v54 = vadd.f32 %v290_v48, %v274_v49  ;;  %v452_v6 = vld [vmem:[#allocation7 + $0x58] sm:$0xff]  ;;  %v429_v45 = vld [vmem:[#allocation5 + $0x20] sm:$0xff]  ;;  %v443_v48 = vld [vmem:[#allocation7 + $0x10] sm:$0xff] }
  0xf0   : > { %v436_v7 = vld [vmem:[#allocation5 + $0x58] sm:$0xff]  ;;  %883 = vmatprep.subr.mxu0 %v452_v6  ;;  %v427_v49 = vld [vmem:[#allocation5 + $0x10] sm:$0xff] }
  0xf1   : > { %v309_v55 = vmul.f32 0.00390625, %v301_v54  ;;  %v356_v58 = vmul.f32 %v1469_v53, %v1469_v53  ;;  %v332_v59 = vmul.f32 %v1466_v52, %v1466_v52  ;;  %927 = vmatprep.subr.mxu1 %v436_v7  ;;  %884 = vmatpush3.msra.mxu0 %v452_v6  ;;  %v444_v46 = vld [vmem:[#allocation7 + $0x18] sm:$0xff]  ;;  %v441_v54 = vld [vmem:[#allocation7] sm:$0xff] }
  0xf2   : > { %v292_v56 = vpop.xlane.xlu1 %291  ;;  %v276_v57 = vpop.xlane.xlu0 %275  ;;  %928 = vmatpush3.msra.mxu1 %v436_v7  ;;  %885 = vmatprep.subr.mxu0 %v451_v17  ;;  %v428_v47 = vld [vmem:[#allocation5 + $0x18] sm:$0xff] }
  0xf3   : > { %v1476_v60 = vsub.f32 %v1410_v9, %v309_v55  ;;  %v1479_v61 = vsub.f32 %v1407_v8, %v309_v55  ;;  %365 = vadd.xlane.f32.xlu1 %v355_v50  ;;  %341 = vadd.xlane.f32.xlu0 %v331_v51  ;;  %v302_v62 = vadd.f32 %v292_v56, %v276_v57  ;;  %v442_v50 = vld [vmem:[#allocation7 + $0x8] sm:$0xff]  ;;  %v425_v55 = vld [vmem:[#allocation5] sm:$0xff] }
  0xf4   : > { %929 = vmatprep.subr.mxu1 %v435_v18  ;;  %886 = vmatpush3.msra.mxu0 %v451_v17  ;;  %v426_v51 = vld [vmem:[#allocation5 + $0x8] sm:$0xff] }
  0xf5   : > { %v310_v1 = vmul.f32 0.00390625, %v302_v62  ;;  %v357_v4 = vmul.f32 %v1479_v61, %v1479_v61  ;;  %v333_v5 = vmul.f32 %v1476_v60, %v1476_v60  ;;  %930 = vmatpush3.msra.mxu1 %v435_v18 }
  0xf6   : > { %v294_v2 = vpop.xlane.xlu1 %293  ;;  %v278_v3 = vpop.xlane.xlu0 %277  ;;  %931 = vmatprep.subr.mxu1 %v434_v23 }
  0xf7   : > { %v1486_v8 = vsub.f32 %v1418_v11, %v310_v1  ;;  %v1489_v9 = vsub.f32 %v1415_v10, %v310_v1  ;;  %367 = vadd.xlane.f32.xlu1 %v356_v58  ;;  %343 = vadd.xlane.f32.xlu0 %v332_v59  ;;  %v303_v16 = vadd.f32 %v294_v2, %v278_v3  ;;  %v450_v10 = vld [vmem:[#allocation7 + $0x48] sm:$0xff] }
  0xf8   : > { %887 = vmatprep.subr.mxu0 %v450_v10  ;;  %932 = vmatpush3.msra.mxu1 %v434_v23 }
  0xf9   : > { %v311_v19 = vmul.f32 0.00390625, %v303_v16  ;;  %v358_v22 = vmul.f32 %v1489_v9, %v1489_v9  ;;  %v334_v11 = vmul.f32 %v1486_v8, %v1486_v8  ;;  %888 = vmatpush3.msra.mxu0 %v450_v10  ;;  %933 = vmatprep.subr.mxu1 %v433_v29 }
  0xfa   : > { %v296_v20 = vpop.xlane.xlu1 %295  ;;  %v280_v21 = vpop.xlane.xlu0 %279  ;;  %889 = vmatprep.subr.mxu0 %v449_v28  ;;  %934 = vmatpush3.msra.mxu1 %v433_v29 }
  0xfb   : > { %v1496_v24 = vsub.f32 %v1426_v13, %v311_v19  ;;  %v1499_v25 = vsub.f32 %v1423_v12, %v311_v19  ;;  %369 = vadd.xlane.f32.xlu1 %v357_v4  ;;  %345 = vadd.xlane.f32.xlu0 %v333_v5  ;;  %v304_v26 = vadd.f32 %v296_v20, %v280_v21 }
  0xfc   : > { %890 = vmatpush3.msra.mxu0 %v449_v28  ;;  %935 = vmatprep.subr.mxu1 %v432_v37 }
  0xfd   : > { %v312_v27 = vmul.f32 0.00390625, %v304_v26  ;;  %v359_v30 = vmul.f32 %v1499_v25, %v1499_v25  ;;  %v335_v31 = vmul.f32 %v1496_v24, %v1496_v24  ;;  %891 = vmatprep.subr.mxu0 %v448_v34  ;;  %936 = vmatpush3.msra.mxu1 %v432_v37 }
  0xfe   : > { %892 = vmatpush3.msra.mxu0 %v448_v34  ;;  %937 = vmatprep.subr.mxu1 %v431_v39 }
  0xff   : > { %v1504_v13 = vsub.f32 %v1434_v15, %v312_v27  ;;  %v1507_v12 = vsub.f32 %v1431_v14, %v312_v27  ;;  %371 = vadd.xlane.f32.xlu1 %v358_v22  ;;  %347 = vadd.xlane.f32.xlu0 %v334_v11 }
 0x100   : > { %893 = vmatprep.subr.mxu0 %v447_v38  ;;  %938 = vmatpush3.msra.mxu1 %v431_v39 }
 0x101   : > { %v360_v14 = vmul.f32 %v1507_v12, %v1507_v12  ;;  %v336_v15 = vmul.f32 %v1504_v13, %v1504_v13  ;;  %894 = vmatpush3.msra.mxu0 %v447_v38  ;;  %939 = vmatprep.subr.mxu1 %v430_v41 }
 0x102   : > { %895 = vmatprep.subr.mxu0 %v446_v40  ;;  %940 = vmatpush3.msra.mxu1 %v430_v41 }
 0x103   : > { %373 = vadd.xlane.f32.xlu1 %v359_v30  ;;  %349 = vadd.xlane.f32.xlu0 %v335_v31 }
 0x104   : > { %896 = vmatpush3.msra.mxu0 %v446_v40  ;;  %941 = vmatprep.subr.mxu1 %v429_v45 }
 0x105   : > { %897 = vmatprep.subr.mxu0 %v445_v42  ;;  %942 = vmatpush3.msra.mxu1 %v429_v45 }
 0x106   : > { %898 = vmatpush3.msra.mxu0 %v445_v42  ;;  %943 = vmatprep.subr.mxu1 %v428_v47 }
 0x107   : > { %375 = vadd.xlane.f32.xlu1 %v360_v14  ;;  %351 = vadd.xlane.f32.xlu0 %v336_v15 }
 0x108   : > { %899 = vmatprep.subr.mxu0 %v444_v46  ;;  %944 = vmatpush3.msra.mxu1 %v428_v47 }
 0x109   : > { %900 = vmatpush3.msra.mxu0 %v444_v46  ;;  %945 = vmatprep.subr.mxu1 %v427_v49 }
 0x10a   : > { %901 = vmatprep.subr.mxu0 %v443_v48  ;;  %946 = vmatpush3.msra.mxu1 %v427_v49 }
 0x10b   : > { %902 = vmatpush3.msra.mxu0 %v443_v48  ;;  %947 = vmatprep.subr.mxu1 %v426_v51 }
 0x10c   : > { %903 = vmatprep.subr.mxu0 %v442_v50  ;;  %948 = vmatpush3.msra.mxu1 %v426_v51 }
 0x10d   : > { %904 = vmatpush3.msra.mxu0 %v442_v50  ;;  %949 = vmatprep.subr.mxu1 %v425_v55 }
 0x10e   : > { %905 = vmatprep.subr.mxu0 %v441_v54  ;;  %950 = vmatpush3.msra.mxu1 %v425_v55 }
 0x10f   : > { %906 = vmatpush3.msra.mxu0 %v441_v54 }
 0x174   : > { %v362_v56 = vpop.xlane.xlu1 %361  ;;  %v338_v57 = vpop.xlane.xlu0 %337 }
 0x175   : > { %v377_v58 = vadd.f32 %v362_v56, %v338_v57 }
 0x177   : > { %v385_v59 = vmul.f32 0.00390625, %v377_v58 }
 0x178   : > { %v364_v62 = vpop.xlane.xlu1 %363  ;;  %v340_v63 = vpop.xlane.xlu0 %339 }
 0x179   : > { %v393_v0 = vadd.f32 1e-05, %v385_v59  ;;  %v378_v1 = vadd.f32 %v364_v62, %v340_v63 }
 0x17b   : > { %1034 = vrsqrt.f32 %v393_v0  ;;  %v386_v2 = vmul.f32 0.00390625, %v378_v1 }
 0x17c   : > { %v366_v3 = vpop.xlane.xlu1 %365  ;;  %v342_v4 = vpop.xlane.xlu0 %341 }
 0x17d   : > { %v394_v5 = vadd.f32 1e-05, %v386_v2  ;;  %v379_v6 = vadd.f32 %v366_v3, %v342_v4 }
 0x17f   : > { %1036 = vrsqrt.f32 %v394_v5  ;;  %v387_v7 = vmul.f32 0.00390625, %v379_v6 }
 0x180   : > { %v368_v16 = vpop.xlane.xlu1 %367  ;;  %v344_v17 = vpop.xlane.xlu0 %343 }
 0x181   : > { %v395_v18 = vadd.f32 1e-05, %v387_v7  ;;  %v380_v19 = vadd.f32 %v368_v16, %v344_v17 }
 0x183   : > { %1038 = vrsqrt.f32 %v395_v18  ;;  %v388_v20 = vmul.f32 0.00390625, %v380_v19 }
 0x184   : > { %v370_v21 = vpop.xlane.xlu1 %369  ;;  %v346_v22 = vpop.xlane.xlu0 %345 }
 0x185   : > { %v396_v11 = vadd.f32 1e-05, %v388_v20  ;;  %v381_v10 = vadd.f32 %v370_v21, %v346_v22 }
 0x187   : > { %1040 = vrsqrt.f32 %v396_v11  ;;  %v389_v23 = vmul.f32 0.00390625, %v381_v10 }
 0x188   : > { %v1035_v26 = vpop.eup %1034  ;;  %v372_v27 = vpop.xlane.xlu1 %371 }
 0x189   : > { %v348_v28 = vpop.xlane.xlu0 %347  ;;  %v397_v29 = vadd.f32 1e-05, %v389_v23  ;;  %v417_v31 = vmul.f32 %v1035_v26, %v1440_v33  ;;  %v409_v34 = vmul.f32 %v1035_v26, %v1438_v32 }
 0x18a   : > { %v382_v30 = vadd.f32 %v372_v27, %v348_v28 }
 0x18b   : > { %1042 = vrsqrt.f32 %v397_v29  ;;  %907 = vmatprep.mubr.f32.mxu0 %v417_v31  ;;  %951 = vmatprep.mubr.f32.mxu1 %v409_v34 }
 0x18c   : > { %v390_v37 = vmul.f32 0.00390625, %v382_v30  ;;  %v1037_v38 = vpop.eup %1036  ;;  %v374_v39 = vpop.xlane.xlu1 %373 }
 0x18d   : > { %v350_v14 = vpop.xlane.xlu0 %349  ;;  %v418_v41 = vmul.f32 %v1037_v38, %v1445_v36  ;;  %v410_v42 = vmul.f32 %v1037_v38, %v1443_v35 }
 0x18e   : > { %v398_v15 = vadd.f32 1e-05, %v390_v37  ;;  %v383_v40 = vadd.f32 %v374_v39, %v350_v14 }
 0x18f   : > { %908 = vmatmul.mubr.f32.vlgmr.msra.gmra.mxu0 %v418_v41  ;;  %952 = vmatmul.mubr.f32.vlgmr.msra.gmra.mxu1 %v410_v42 }
 0x190   : > { %1044 = vrsqrt.f32 %v398_v15  ;;  %v391_v45 = vmul.f32 0.00390625, %v383_v40  ;;  %v1039_v33 = vpop.eup %1038  ;;  %v376_v46 = vpop.xlane.xlu1 %375 }
 0x191   : > { %v352_v32 = vpop.xlane.xlu0 %351  ;;  %v419_v49 = vmul.f32 %v1039_v33, %v1455_v44  ;;  %v411_v50 = vmul.f32 %v1039_v33, %v1452_v43 }
 0x192   : > { %v399_v47 = vadd.f32 1e-05, %v391_v45  ;;  %v384_v48 = vadd.f32 %v376_v46, %v352_v32 }
 0x193   : > { %910 = vmatprep.mubr.f32.mxu0 %v419_v49  ;;  %954 = vmatprep.mubr.f32.mxu1 %v411_v50 }
 0x194   : > { %1046 = vrsqrt.f32 %v399_v47  ;;  %v392_v51 = vmul.f32 0.00390625, %v384_v48  ;;  %v1041_v36 = vpop.eup %1040 }
 0x195   : > { %v420_v35 = vmul.f32 %v1041_v36, %v1469_v53  ;;  %v412_v55 = vmul.f32 %v1041_v36, %v1466_v52 }
 0x196   : > { %v400_v54 = vadd.f32 1e-05, %v392_v51 }
 0x197   : > { %911 = vmatmul.mubr.f32.gmra.mxu0 %v420_v35  ;;  %955 = vmatmul.mubr.f32.gmra.mxu1 %v412_v55 }
 0x198   : > { %1048 = vrsqrt.f32 %v400_v54  ;;  %v1043_v56 = vpop.eup %1042 }
 0x199   : > { %v421_v57 = vmul.f32 %v1043_v56, %v1479_v61  ;;  %v413_v44 = vmul.f32 %v1043_v56, %v1476_v60 }
 0x19b   : > { %913 = vmatprep.mubr.f32.mxu0 %v421_v57  ;;  %957 = vmatprep.mubr.f32.mxu1 %v413_v44 }
 0x19d   : > { %v1045_v43 = vpop.eup %1044 }
 0x19e   : > { %v422_v58 = vmul.f32 %v1045_v43, %v1489_v9  ;;  %v414_v59 = vmul.f32 %v1045_v43, %v1486_v8  ;;  %v818_v8 = vld [vmem:[%s1598_s3] ss:$0 sm:$0xff] }
 0x1a0   : > { %914 = vmatmul.mubr.f32.gmra.mxu0 %v422_v58  ;;  %958 = vmatmul.mubr.f32.gmra.mxu1 %v414_v59 }
 0x1a1   : > { %v1047_v53 = vpop.eup %1046 }
 0x1a2   : > { %v423_v52 = vmul.f32 %v1047_v53, %v1499_v25  ;;  %v415_v62 = vmul.f32 %v1047_v53, %v1496_v24 }
 0x1a4   : > { %916 = vmatprep.mubr.f32.mxu0 %v423_v52  ;;  %960 = vmatprep.mubr.f32.mxu1 %v415_v62 }
 0x1a5   : > { %v1049_v61 = vpop.eup %1048 }
 0x1a6   : > { %v424_v60 = vmul.f32 %v1049_v61, %v1507_v12  ;;  %v416_v63 = vmul.f32 %v1049_v61, %v1504_v13 }
 0x1a8   : > { %917 = vmatmul.mubr.f32.gmra.mxu0 %v424_v60  ;;  %961 = vmatmul.mubr.f32.gmra.mxu1 %v416_v63 }
 0x24f   : > { %v909_v9 = vpop.f32.mrf.mxu0  ;;  %v953_v0 = vpop.f32.mrf.mxu1 }
 0x250   : > { %v634_v1 = vadd.f32 %v953_v0, %v909_v9 }
 0x251   : > { %v523_v25 = vpop.f32.mrf.mxu0  ;;  %v628_v2 = vpop.f32.mrf.mxu1 }
 0x252   : > { %v675_v24 = vadd.f32 %v818_v8, %v634_v1  ;;  %v629_v3 = vadd.f32 %v628_v2, %v523_v25 }
 0x254   : > { %683 = vst [vmem:[%s1535_s5 + $0x8] sm:$0xff] %v675_v24  ;;  %v674_v13 = vadd.f32 %v818_v8, %v629_v3 }
 0x256   : > { %682 = vst [vmem:[%s1535_s5] sm:$0xff] %v674_v13 }
 0x257   : > { %v912_v12 = vpop.f32.mrf.mxu0  ;;  %v956_v4 = vpop.f32.mrf.mxu1 }
 0x258   : > { %v644_v5 = vadd.f32 %v956_v4, %v912_v12 }
 0x259   : > { %v533_v6 = vpop.f32.mrf.mxu0  ;;  %v638_v7 = vpop.f32.mrf.mxu1 }
 0x25a   : > { %v677_v16 = vadd.f32 %v818_v8, %v644_v5  ;;  %v639_v17 = vadd.f32 %v638_v7, %v533_v6 }
 0x25c   : > { %685 = vst [vmem:[%s1535_s5 + $0x18] sm:$0xff] %v677_v16  ;;  %v676_v18 = vadd.f32 %v818_v8, %v639_v17 }
 0x25e   : > { %684 = vst [vmem:[%s1535_s5 + $0x10] sm:$0xff] %v676_v18 }
 0x260   : > { %v915_v19 = vpop.f32.mrf.mxu0  ;;  %v959_v20 = vpop.f32.mrf.mxu1 }
 0x261   : > { %v654_v21 = vadd.f32 %v959_v20, %v915_v19 }
 0x262   : > { %v543_v22 = vpop.f32.mrf.mxu0  ;;  %v648_v11 = vpop.f32.mrf.mxu1 }
 0x263   : > { %v679_v10 = vadd.f32 %v818_v8, %v654_v21  ;;  %v649_v23 = vadd.f32 %v648_v11, %v543_v22 }
 0x265   : > { %687 = vst [vmem:[%s1535_s5 + $0x28] sm:$0xff] %v679_v10  ;;  %v678_v26 = vadd.f32 %v818_v8, %v649_v23 }
 0x267   : > { %686 = vst [vmem:[%s1535_s5 + $0x20] sm:$0xff] %v678_v26 }
 0x268   : > { %v918_v27 = vpop.f32.mrf.mxu0  ;;  %v962_v28 = vpop.f32.mrf.mxu1 }
 0x269   : > { %v664_v29 = vadd.f32 %v962_v28, %v918_v27 }
 0x26a   : > { %v553_v30 = vpop.f32.mrf.mxu0  ;;  %v658_v31 = vpop.f32.mrf.mxu1 }
 0x26b   : > { %v681_v34 = vadd.f32 %v818_v8, %v664_v29  ;;  %v659_v37 = vadd.f32 %v658_v31, %v553_v30 }
 0x26d   : > { %689 = vst [vmem:[%s1535_s5 + $0x38] sm:$0xff] %v681_v34  ;;  %v680_v38 = vadd.f32 %v818_v8, %v659_v37 }
 0x26f   : > { %688 = vst [vmem:[%s1535_s5 + $0x30] sm:$0xff] %v680_v38 }
 0x270   : > { %1143 = shalt.err (!%p1140_p3)
}
 0x271   : > { %s1144_s13 = scalar_lea.hbm %s1550_s27, 1024  ;;  %s1148_s21 = scalar_lea.hbm %s1599_s4, 2048 }
 0x272   : > { %p1145_p11 = scmp.ne.s32.totalorder %s1550_s27, %s1144_s13  ;;  %p1149_p4 = scmp.lt.s32.totalorder %s1550_s27, %s1599_s4 }
 0x273   : > { %p1150_p6 = scmp.lt.s32.totalorder %s1148_s21, %s1144_s13 }
 0x274   : > { %p1146_p9 = pnand %p1145_p11, %p1614_p2 }
 0x275   : > { %p1151_p8 = por %p1150_p6, %p1149_p4 }
 0x276   : > { %p1147_p1 = pneg %p1146_p9 }
 0x278   : > { %p1152_p5 = pnand %p1151_p8, %p1147_p1 }
 0x27a   : > { %1155 = shalt.err (!%p1152_p5)
}
 0x27b   : > { %s1206_s5 = smov 128   ;;  %s1207_s7 = smov 8  }
 0x27c   : > { %973 = dma.vmem_to_hbm [thread:$0]  (%p1614_p2), %s1545_s29, 1024, %s1550_s27, %s691_s24, %s1206_s5, %s1206_s5, %s1207_s7  }
 0x27d PF: > { %s719_s8 = sand.u32 1, %s1186_s15   ;;  %p1615_p7 = scmp.ne.s32.totalorder %s1605_s22, 0 }
 0x27e   : > { %p1616_p12 = scmp.ge.s32.totalorder %s1198_s18, 2  ;;  %s720_s9 = scalar_lea.sflag [#allocation4], %s719_s8 }
 0x280   : > { %p987_p13 = pnand %p1616_p12, %p1615_p7 }
 0x282   : > { %p988_p0 = pneg %p987_p13 }
 0x284   : > { %1181 = dma.done.wait (%p988_p0), %s720_s9, 1024  }
 0x285   : > { %1183 = vsyncadd (%p988_p0), %s720_s9, 4294966272  ;;  %p18_p10 = scmp.ge.s32.totalorder %s1311_s11, 4   ;;  %s1617_s15 = smov %s1190_s16 }
 0x286   : > { %s1618_s16 = smov %s1194_s17  ;;  %s1619_s17 = smov %s1327_s20 }
 0x287   : > { %s1620_s18 = smov %s1311_s11  ;;  %20 = sbr.rel (!%p18_p10) target bundleno = 6 (0x6), region = 90 }
 0x28c   :  { %725 = vsyncpa [#allocation3], 1 }
 0x28d   :  { %727 = vsyncpa [#allocation3 + $0x1], 1 }
 0x28e   :  { %728 = vsyncpa [#allocation6], 1 }
 0x28f   :  { %729 = vsyncpa [#allocation4], 1 }
 0x290   :  { %731 = vsyncpa [#allocation4 + $0x1], 1 }

</bundles_post_ra>
